<compile_context>
chip_gen: v7x
topology: tpu7x:2x2x1
jax: 0.10.0
libtpu: 0.0.40
codegen_flags: <defaults>
</compile_context>

<pallas_src>
import functools

import jax
import jax.numpy as jnp
from jax import lax
from jax.experimental import pallas as pl
from jax.experimental.pallas import tpu as pltpu


def rnn_head_kernel(ids_ref, emb_ih_ref, whh_ref, b_ref,
                    wlin_ref, blin_ref, out_ref, *, seq_len, batch):
    """Fused embedding-gather + input-proj + tanh-RNN recurrence + Linear head.

    ids_ref    : (T*B, 1) int32  token ids, time-major flattened (row = t*B + b)
    emb_ih_ref : (V, H)   f32    embedding table pre-folded with W_ih^T
                                 (row 0 zeroed -> padding_idx=0)
    whh_ref    : (H, H)   f32    RNN hidden weight (pre-transposed)
    b_ref      : (1, H)   f32    b_ih + b_hh
    wlin_ref   : (H, C)   f32    Linear weight (pre-transposed)
    blin_ref   : (1, C)   f32    Linear bias
    out_ref    : (B, C)   f32    logits
    """
    V = emb_ih_ref.shape[0]
    H = whh_ref.shape[1]
    TB = seq_len * batch

    # Embedding gather fused with the input projection: one-hot @ (emb @ W_ih^T).
    # Exact (0/1 weights), MXU-friendly, and the per-step bias is hoisted here.
    ids = ids_ref[...]                                        # (TB, 1)
    cols = lax.broadcasted_iota(jnp.int32, (TB, V), 1)        # (TB, V)
    onehot = (cols == ids).astype(jnp.float32)
    xw = (jnp.dot(onehot, emb_ih_ref[...],
                  preferred_element_type=jnp.float32)
          + b_ref[...])                                       # (TB, H)

    whh = whh_ref[...]
    # Recurrence: h stays in registers; fully unrolled (T static & small).
    # Serial chain per step = one (B, H) @ (H, H) matmul + tanh (EUP slot).
    h = jnp.zeros((batch, H), jnp.float32)
    for t in range(seq_len):
        x_t = xw[t * batch:(t + 1) * batch, :]                # static row block
        h = jnp.tanh(x_t + jnp.dot(h, whh,
                                   preferred_element_type=jnp.float32))

    out_ref[...] = (jnp.dot(h, wlin_ref[...],
                            preferred_element_type=jnp.float32)
                    + blin_ref[...])


def torch_net_forward(x_tokens, params):
    """Forward pass equivalent to TorchNet.forward(x) (inference branch)."""
    B, T = x_tokens.shape
    C = params["w_lin_t"].shape[1]

    # Time-major flattened ids so timestep t occupies rows [t*B, (t+1)*B).
    ids = jnp.transpose(x_tokens).reshape(T * B, 1).astype(jnp.int32)

    vmem = pl.BlockSpec(memory_space=pltpu.MemorySpace.VMEM)
    kernel = functools.partial(rnn_head_kernel, seq_len=T, batch=B)
    return pl.pallas_call(
        kernel,
        out_shape=jax.ShapeDtypeStruct((B, C), jnp.float32),
        in_specs=[vmem] * 6,
        out_specs=vmem,
    )(ids, params["emb_ih_t"],
      params["w_hh_t"], params["b_rnn"],
      params["w_lin_t"], params["b_lin"])


def reference_forward(x_tokens, params):
    """Pure-JAX reference mirroring the torch module's semantics."""
    emb = params["embedding"]
    x_emb = emb[x_tokens].astype(jnp.float32)    # (B, T, D)
    B, T, _ = x_emb.shape
    H = params["w_hh_t"].shape[0]
    h = jnp.zeros((B, H), jnp.float32)
    for t in range(T):
        h = jnp.tanh(x_emb[:, t, :] @ params["w_ih_t"]
                     + h @ params["w_hh_t"] + params["b_rnn"])
    return h @ params["w_lin_t"] + params["b_lin"]


def init_params(key, vocab_size, vector_dim, hidden=20, num_classes=7):
    k = jax.random.split(key, 7)
    # nn.Embedding: N(0,1) init, padding_idx=0 row zeroed.
    emb = jax.random.normal(k[0], (vocab_size, vector_dim), jnp.float32)
    emb = emb.at[0].set(0.0)
    # nn.RNN: uniform(-1/sqrt(H), 1/sqrt(H)).
    s = 1.0 / jnp.sqrt(hidden)
    w_ih = jax.random.uniform(k[1], (hidden, vector_dim), jnp.float32, -s, s)
    w_hh = jax.random.uniform(k[2], (hidden, hidden), jnp.float32, -s, s)
    b_ih = jax.random.uniform(k[3], (hidden,), jnp.float32, -s, s)
    b_hh = jax.random.uniform(k[4], (hidden,), jnp.float32, -s, s)
    # nn.Linear(in_features=hidden (== vector_idm in the module), 7):
    # weight shape (num_classes, hidden), bound 1/sqrt(in_features).
    s_lin = 1.0 / jnp.sqrt(hidden)
    w_lin = jax.random.uniform(k[5], (num_classes, hidden), jnp.float32,
                               -s_lin, s_lin)
    b_lin = jax.random.uniform(k[6], (num_classes,), jnp.float32,
                               -s_lin, s_lin)
    return {
        "embedding": emb,                           # (V, D)   for the reference
        "w_ih_t": w_ih.T,                           # (D, H)   for the reference
        # One-time (inference-only) fold of the input projection into the
        # embedding table: gather + x @ W_ih^T become a single kernel matmul.
        "emb_ih_t": emb @ w_ih.T,                   # (V, H)
        "w_hh_t": w_hh.T,                           # (H, H)
        "b_rnn": (b_ih + b_hh).reshape(1, hidden),  # (1, H)
        "w_lin_t": w_lin.T,                         # (H, C)
        "b_lin": b_lin.reshape(1, num_classes),     # (1, C)
    }


# TODO(synk): the training branch (F.cross_entropy when y is given) is not
# implemented; only the inference forward path is translated.

if __name__ == "__main__":
    key = jax.random.PRNGKey(0)
    vocab_size = 30      # len(vocab)
    vector_dim = 20      # vector_idm (== RNN input_size == hidden_size)
    hidden = 20
    batch = 2
    seq_len = 8

    pkey, xkey = jax.random.split(key)
    params = init_params(pkey, vocab_size, vector_dim, hidden=hidden)

    x_tokens = jax.random.randint(xkey, (batch, seq_len), 0, vocab_size,
                                  dtype=jnp.int32)

    y_pred = torch_net_forward(x_tokens, params)
    y_pred = jax.block_until_ready(y_pred)

    y_ref = reference_forward(x_tokens, params)
    assert y_pred.shape == (batch, 7)
    assert jnp.allclose(y_pred, y_ref, atol=1e-5, rtol=1e-5)

    print("KERNEL_OK")
</pallas_src>

<mosaic_0001>
module attributes {stable_mosaic.version = 11 : i64} {
  func.func @rnn_head_kernel(%arg0: memref<16x1xi32, #tpu.memory_space<vmem>>, %arg1: memref<30x20xf32, #tpu.memory_space<vmem>>, %arg2: memref<20x20xf32, #tpu.memory_space<vmem>>, %arg3: memref<1x20xf32, #tpu.memory_space<vmem>>, %arg4: memref<20x7xf32, #tpu.memory_space<vmem>>, %arg5: memref<1x7xf32, #tpu.memory_space<vmem>>, %arg6: memref<2x7xf32, #tpu.memory_space<vmem>>) attributes {dimension_semantics = [], scalar_prefetch = 0 : i64, scratch_operands = 0 : i64, tpu.core_type = #tpu.core_type<tc>} {
    %c0 = arith.constant 0 : index
    %c0_0 = arith.constant 0 : index
    %0 = vector.load %arg0[%c0, %c0_0] : memref<16x1xi32, #tpu.memory_space<vmem>>, vector<16x1xi32>
    %1 = tpu.iota {dimensions = array<i32: 1>} : vector<16x30xi32>
    %2 = vector.broadcast %0 : vector<16x1xi32> to vector<16x30xi32>
    %3 = arith.cmpi eq, %1, %2 : vector<16x30xi32>
    %4 = arith.extui %3 : vector<16x30xi1> to vector<16x30xi32>
    %5 = arith.sitofp %4 : vector<16x30xi32> to vector<16x30xf32>
    %c0_1 = arith.constant 0 : index
    %c0_2 = arith.constant 0 : index
    %6 = vector.load %arg1[%c0_1, %c0_2] : memref<30x20xf32, #tpu.memory_space<vmem>>, vector<30x20xf32>
    %cst = arith.constant dense<0.000000e+00> : vector<16x20xf32>
    %7 = tpu.matmul %5, %6, %cst {dimension_numbers = #tpu.dot_dimension_numbers<[1], [0], [0], [1], [0, 0, 1, 1], [], []>} : vector<16x30xf32>, vector<30x20xf32>, vector<16x20xf32> -> vector<16x20xf32>
    %c0_3 = arith.constant 0 : index
    %c0_4 = arith.constant 0 : index
    %8 = vector.load %arg3[%c0_3, %c0_4] : memref<1x20xf32, #tpu.memory_space<vmem>>, vector<1x20xf32>
    %9 = vector.broadcast %8 : vector<1x20xf32> to vector<16x20xf32>
    %10 = arith.addf %7, %9 : vector<16x20xf32>
    %c0_5 = arith.constant 0 : index
    %c0_6 = arith.constant 0 : index
    %11 = vector.load %arg2[%c0_5, %c0_6] : memref<20x20xf32, #tpu.memory_space<vmem>>, vector<20x20xf32>
    %cst_7 = arith.constant 0.000000e+00 : f32
    %12 = vector.broadcast %cst_7 : f32 to vector<2x20xf32>
    %13 = vector.extract_strided_slice %10 {offsets = [0, 0], sizes = [2, 20], strides = [1, 1]} : vector<16x20xf32> to vector<2x20xf32>
    %cst_8 = arith.constant dense<0.000000e+00> : vector<2x20xf32>
    %14 = tpu.matmul %12, %11, %cst_8 {dimension_numbers = #tpu.dot_dimension_numbers<[1], [0], [0], [1], [0, 0, 1, 1], [], []>} : vector<2x20xf32>, vector<20x20xf32>, vector<2x20xf32> -> vector<2x20xf32>
    %15 = arith.addf %13, %14 : vector<2x20xf32>
    %16 = math.tanh %15 : vector<2x20xf32>
    %17 = vector.extract_strided_slice %10 {offsets = [2, 0], sizes = [2, 20], strides = [1, 1]} : vector<16x20xf32> to vector<2x20xf32>
    %cst_9 = arith.constant dense<0.000000e+00> : vector<2x20xf32>
    %18 = tpu.matmul %16, %11, %cst_9 {dimension_numbers = #tpu.dot_dimension_numbers<[1], [0], [0], [1], [0, 0, 1, 1], [], []>} : vector<2x20xf32>, vector<20x20xf32>, vector<2x20xf32> -> vector<2x20xf32>
    %19 = arith.addf %17, %18 : vector<2x20xf32>
    %20 = math.tanh %19 : vector<2x20xf32>
    %21 = vector.extract_strided_slice %10 {offsets = [4, 0], sizes = [2, 20], strides = [1, 1]} : vector<16x20xf32> to vector<2x20xf32>
    %cst_10 = arith.constant dense<0.000000e+00> : vector<2x20xf32>
    %22 = tpu.matmul %20, %11, %cst_10 {dimension_numbers = #tpu.dot_dimension_numbers<[1], [0], [0], [1], [0, 0, 1, 1], [], []>} : vector<2x20xf32>, vector<20x20xf32>, vector<2x20xf32> -> vector<2x20xf32>
    %23 = arith.addf %21, %22 : vector<2x20xf32>
    %24 = math.tanh %23 : vector<2x20xf32>
    %25 = vector.extract_strided_slice %10 {offsets = [6, 0], sizes = [2, 20], strides = [1, 1]} : vector<16x20xf32> to vector<2x20xf32>
    %cst_11 = arith.constant dense<0.000000e+00> : vector<2x20xf32>
    %26 = tpu.matmul %24, %11, %cst_11 {dimension_numbers = #tpu.dot_dimension_numbers<[1], [0], [0], [1], [0, 0, 1, 1], [], []>} : vector<2x20xf32>, vector<20x20xf32>, vector<2x20xf32> -> vector<2x20xf32>
    %27 = arith.addf %25, %26 : vector<2x20xf32>
    %28 = math.tanh %27 : vector<2x20xf32>
    %29 = vector.extract_strided_slice %10 {offsets = [8, 0], sizes = [2, 20], strides = [1, 1]} : vector<16x20xf32> to vector<2x20xf32>
    %cst_12 = arith.constant dense<0.000000e+00> : vector<2x20xf32>
    %30 = tpu.matmul %28, %11, %cst_12 {dimension_numbers = #tpu.dot_dimension_numbers<[1], [0], [0], [1], [0, 0, 1, 1], [], []>} : vector<2x20xf32>, vector<20x20xf32>, vector<2x20xf32> -> vector<2x20xf32>
    %31 = arith.addf %29, %30 : vector<2x20xf32>
    %32 = math.tanh %31 : vector<2x20xf32>
    %33 = vector.extract_strided_slice %10 {offsets = [10, 0], sizes = [2, 20], strides = [1, 1]} : vector<16x20xf32> to vector<2x20xf32>
    %cst_13 = arith.constant dense<0.000000e+00> : vector<2x20xf32>
    %34 = tpu.matmul %32, %11, %cst_13 {dimension_numbers = #tpu.dot_dimension_numbers<[1], [0], [0], [1], [0, 0, 1, 1], [], []>} : vector<2x20xf32>, vector<20x20xf32>, vector<2x20xf32> -> vector<2x20xf32>
    %35 = arith.addf %33, %34 : vector<2x20xf32>
    %36 = math.tanh %35 : vector<2x20xf32>
    %37 = vector.extract_strided_slice %10 {offsets = [12, 0], sizes = [2, 20], strides = [1, 1]} : vector<16x20xf32> to vector<2x20xf32>
    %cst_14 = arith.constant dense<0.000000e+00> : vector<2x20xf32>
    %38 = tpu.matmul %36, %11, %cst_14 {dimension_numbers = #tpu.dot_dimension_numbers<[1], [0], [0], [1], [0, 0, 1, 1], [], []>} : vector<2x20xf32>, vector<20x20xf32>, vector<2x20xf32> -> vector<2x20xf32>
    %39 = arith.addf %37, %38 : vector<2x20xf32>
    %40 = math.tanh %39 : vector<2x20xf32>
    %41 = vector.extract_strided_slice %10 {offsets = [14, 0], sizes = [2, 20], strides = [1, 1]} : vector<16x20xf32> to vector<2x20xf32>
    %cst_15 = arith.constant dense<0.000000e+00> : vector<2x20xf32>
    %42 = tpu.matmul %40, %11, %cst_15 {dimension_numbers = #tpu.dot_dimension_numbers<[1], [0], [0], [1], [0, 0, 1, 1], [], []>} : vector<2x20xf32>, vector<20x20xf32>, vector<2x20xf32> -> vector<2x20xf32>
    %43 = arith.addf %41, %42 : vector<2x20xf32>
    %44 = math.tanh %43 : vector<2x20xf32>
    %c0_16 = arith.constant 0 : index
    %c0_17 = arith.constant 0 : index
    %45 = vector.load %arg4[%c0_16, %c0_17] : memref<20x7xf32, #tpu.memory_space<vmem>>, vector<20x7xf32>
    %cst_18 = arith.constant dense<0.000000e+00> : vector<2x7xf32>
    %46 = tpu.matmul %44, %45, %cst_18 {dimension_numbers = #tpu.dot_dimension_numbers<[1], [0], [0], [1], [0, 0, 1, 1], [], []>} : vector<2x20xf32>, vector<20x7xf32>, vector<2x7xf32> -> vector<2x7xf32>
    %c0_19 = arith.constant 0 : index
    %c0_20 = arith.constant 0 : index
    %47 = vector.load %arg5[%c0_19, %c0_20] : memref<1x7xf32, #tpu.memory_space<vmem>>, vector<1x7xf32>
    %48 = vector.broadcast %47 : vector<1x7xf32> to vector<2x7xf32>
    %49 = arith.addf %46, %48 : vector<2x7xf32>
    %c0_21 = arith.constant 0 : index
    %c0_22 = arith.constant 0 : index
    %50 = vector.load %arg6[%c0_21, %c0_22] : memref<2x7xf32, #tpu.memory_space<vmem>>, vector<2x7xf32>
    tpu.vector_store %arg6[%c0_21, %c0_22], %49 {strides = array<i32>} : memref<2x7xf32, #tpu.memory_space<vmem>>, vector<2x7xf32>,
    return
  }
}

</mosaic_0001>

<bundles_post_ra>
// kernel: tpu_custom_call.1
= control target key start
LH: loop header
LB: loop body
LE: loop exit
PB: predicated region body
PF: predicated region fallthrough
CT: control target
= control target key end

     0   :  { %v1113_v2 = vmov 0   ;;  %vm58_vm0 = vcmask 1045504   ;;  %s1290_s0 = inlined_call_operand.vmem [shape: s32[16,1], index: 0, kind: input, shape index: {}]   ;;  %s1291_s1 = inlined_call_operand.vmem [shape: f32[30,20], index: 1, kind: input, shape index: {}]   ;;  %s1292_s2 = inlined_call_operand.vmem [shape: f32[20,20], index: 2, kind: input, shape index: {}]   ;;  %s1293_s3 = inlined_call_operand.vmem [shape: f32[1,20], index: 3, kind: input, shape index: {}]   ;;  %s1294_s4 = inlined_call_operand.vmem [shape: f32[20,7], index: 4, kind: input, shape index: {}]   ;;  %s1295_s5 = inlined_call_operand.vmem [shape: f32[1,7], index: 5, kind: input, shape index: {}]   ;;  %s1296_s6 = inlined_call_operand.hbm [shape: f32[2,7], index: 6, kind: output, shape index: {}]  }
   0x1   :  { %v24_v0 = vld [vmem:[%s1290_s0] sm:$0xff]  ;;  %1072 = vset.pattern.permute.xlu0 %v1113_v2  ;;  %v41_v3 = vld [vmem:[%s1291_s1 + $0x8] sm:$0xff]  ;;  %v42_v4 = vld [vmem:[%s1291_s1 + $0x10] sm:$0xff] }
   0x2   :  { %v40_v1 = vld [vmem:[%s1291_s1] sm:$0xff]  ;;  %v43_v5 = vld [vmem:[%s1291_s1 + $0x18] sm:$0x3f]  ;;  %29 = vperm.xlu0 %1072, %v24_v0   ;;  %v138_v9 = vld [vmem:[%s1292_s2 + $0x8] sm:$0xff] }
   0x3   :  { %v1029_v6 = vpack.c.bf16 %v41_v3, %v40_v1  ;;  %v1033_v7 = vpack.c.bf16 %v43_v5, %v42_v4  ;;  %v137_v8 = vld [vmem:[%s1292_s2] sm:$0xff] }
   0x4   :  { %11 = vsyncpa [#allocation3], 0  ;;  %v25_v10 = vld [vmem:[%s1290_s0 + $0x8] sm:$0xff]  ;;  %vm1114_vm1 = vmmov 1   ;;  %v1115_v11 = vmov 0.0|0.0   ;;  %v1179_v12 = vpack.c.bf16 %v138_v9, %v137_v8  ;;  %v1116_v13 = vmov 0.0  }
   0x5   :  { %1030 = vmatprep.subr.bf16.mxu0 %v1029_v6  ;;  %vm1034_vm2 = vmpackc.low %vm58_vm0, %vm1114_vm1  ;;  %1039 = vmatprep.subr.bf16.mxu1 %v1115_v11  ;;  %v1186_v14 = vld [vmem:[%s1292_s2 + $0x10] sm:$0xf]  ;;  %vm144_vm3 = vcmask 1043456   ;;  %vm1117_vm4 = vmmov 0   ;;  %v26_v15 = vlaneseq  ;;  %vm51_vm5 = vcmask 244736   ;;  %v768_v0 = vld [vmem:[%s1294_s4] sm:$0xff] }
   0x6   :  { %1032 = vmatpush3.bf16.msra.mxu0 %v1029_v6  ;;  %32 = vperm.xlu0 %1072, %v25_v10   ;;  %v873_v23 = vld [vmem:[%s1293_s3] ss:$0 sm:$0xff]  ;;  %vm140_vm8 = vcmask 162816   ;;  %v769_v1 = vld [vmem:[%s1294_s4 + $0x8] sm:$0xff]  ;;  %v770_v3 = vld [vmem:[%s1294_s4 + $0x10] sm:$0xf] }
   0x7   :  { %1035 = vmatprep.subr.msk.bf16.mxu0 %vm1034_vm2, %v1033_v7  ;;  %1041 = vmatpush3.bf16.msra.mxu1 %v1179_v12  ;;  %v27_v16 = vand.u32 127, %v26_v15  ;;  %v1064_v2 = vpack.c.bf16 %v769_v1, %v768_v0  ;;  %v892_v10 = vld [vmem:[%s1295_s5] ss:$0 sm:$0xff]  ;;  %s1118_s21 = smov [#allocation2]   ;;  %vm855_vm9 = vcmask 50176  }
   0x8   :  { %952 = vmatprep.subr.mxu1 %v1116_v13  ;;  %954 = vmatprep.mubr.msk.f32.mxu1 %vm1117_vm4, %v1116_v13  ;;  %s863_s22 = sshll.u32 %s1118_s21, 4  ;;  %s864_s22 = int_to_ptr.vmem [resolvable:$true] %s863_s22 }
   0x9   :  { %s1089_s4 = scalar_lea.vmem %s864_s22, 32  ;;  %p1094_p1 = scmp.lt.s32.totalorder %s864_s22, %s864_s22 }
   0xa   :  { %1038 = vmatpush3.bf16.msk.msra.mxu0 %vm1034_vm2, %v1033_v7  ;;  %p1090_p0 = scmp.ne.s32.totalorder %s864_s22, %s1089_s4  ;;  %p1095_p2 = scmp.lt.s32.totalorder %s1089_s4, %s1089_s4 }
   0xb   :  { %1045 = vmatprep.subr.bf16.mxu0 %v1115_v11  ;;  %953 = vmatpush3.msk.msra.mxu1 %vm144_vm3, %v1186_v14 }
   0xc   :  { %955 = vmatmul.mubr.f32.vlgmr.msra.gmra.mrb[0].mxu1 %v1116_v13  ;;  %1042 = vmatprep.subr.bf16.mxu1 %v1115_v11  ;;  %p1096_p3 = por %p1095_p2, %p1094_p1 }
   0xd   :  { %1044 = vmatpush3.bf16.msra.mxu1 %v1179_v12  ;;  %963 = vmatprep.mubr.msk.f32.mxu1 %vm1117_vm4, %v1116_v13 }
   0xe   :  { %961 = vmatprep.subr.mxu1 %v1116_v13  ;;  %p1097_p4 = pnand %p1096_p3, %p1090_p0 }
  0x11   :  { %962 = vmatpush3.msk.msra.mxu1 %vm144_vm3, %v1186_v14 }
  0x12   :  { %1048 = vmatprep.subr.bf16.mxu1 %v1115_v11 }
  0x81   :  { %v30_v17 = vpop.permute.xlu0 %29 }
  0x82   :  { %vm34_vm6 = vcmp.eq.s32.totalorder %v27_v16, %v30_v17 }
  0x83   :  { %v871_v18 = vsel %vm34_vm6, 1.0, %v1116_v13 }
  0x84   :  { %945 = vmatprep.mubr.msk.f32.mxu0 %vm51_vm5, %v871_v18 }
  0x85   :  { %v33_v19 = vpop.permute.xlu0 %32 }
  0x86   :  { %vm35_vm7 = vcmp.eq.s32.totalorder %v27_v16, %v33_v19 }
  0x87   :  { %v872_v20 = vsel %vm35_vm7, 1.0, %v1116_v13 }
  0x88   :  { %946 = vmatmul.mubr.msk.f32.vlgmr.msra.gmra.mrb[0].mxu0 %vm51_vm5, %v872_v20 }
  0x89   :  { %1047 = vmatpush3.bf16.msra.mxu0 %v1179_v12  ;;  %972 = vmatprep.mubr.msk.f32.mxu0 %vm1117_vm4, %v1116_v13 }
  0x8a   :  { %970 = vmatprep.subr.mxu0 %v1116_v13 }
  0x8d   :  { %971 = vmatpush3.msk.msra.mxu0 %vm144_vm3, %v1186_v14 }
  0x8e   :  { %1051 = vmatprep.subr.bf16.mxu0 %v1115_v11 }
  0xdf   :  { %v214_v21 = vpop.f32.mrb[0].mxu1 }
  0xe0   :  { %v956_v22 = vpop.f32.mrb[1].mxu1 }
 0x15b   :  { %v947_v24 = vpop.f32.mrb[0].mxu0 }
 0x15c   :  { %v1214_v25 = vadd.f32 %v947_v24, %v873_v23  ;;  %v128_v26 = vpop.f32.mrb[1].mxu0 }
 0x15d   :  { %v129_v27 = vadd.f32 %v873_v23, %v128_v26 }
 0x15f   :  { %v218_v28 = vadd.f32 %v214_v21, %v129_v27 }
 0x161   :  { %1073 = vtanh.f32 %v218_v28 }
 0x16b   :  { %v1074_v29 = vpop.eup %1073 }
 0x16c   :  { %964 = vmatmul.mubr.msk.f32.vlgmr.msra.gmra.mrb[2].mxu1 %vm140_vm8, %v1074_v29 }
 0x16d   :  { %1050 = vmatpush3.bf16.msra.mxu1 %v1179_v12  ;;  %981 = vmatprep.mubr.msk.f32.mxu1 %vm1117_vm4, %v1116_v13 }
 0x16e   :  { %979 = vmatprep.subr.mxu1 %v1116_v13 }
 0x171   :  { %980 = vmatpush3.msk.msra.mxu1 %vm144_vm3, %v1186_v14 }
 0x172   :  { %1054 = vmatprep.subr.bf16.mxu1 %v1115_v11 }
 0x23f   :  { %v289_v30 = vpop.f32.mrb[2].mxu1 }
 0x240   :  { %v294_v31 = vrot.slane %v289_v30, 6  ;;  %v965_v32 = vpop.f32.mrb[3].mxu1 }
 0x242   :  { %v296_v33 = vadd.f32 %v294_v31, %v129_v27 }
 0x244   :  { %1075 = vtanh.f32 %v296_v33 }
 0x24e   :  { %v1076_v34 = vpop.eup %1075 }
 0x24f   :  { %v299_v35 = vrot.slane %v1076_v34, 2 }
 0x251   :  { %973 = vmatmul.mubr.msk.f32.vlgmr.msra.gmra.mrb[2].mxu0 %vm140_vm8, %v299_v35 }
 0x252   :  { %1053 = vmatpush3.bf16.msra.mxu0 %v1179_v12  ;;  %990 = vmatprep.mubr.msk.f32.mxu0 %vm1117_vm4, %v1116_v13 }
 0x253   :  { %988 = vmatprep.subr.mxu0 %v1116_v13 }
 0x256   :  { %989 = vmatpush3.msk.msra.mxu0 %vm144_vm3, %v1186_v14 }
 0x257   :  { %1057 = vmatprep.subr.bf16.mxu0 %v1115_v11 }
 0x324   :  { %v368_v36 = vpop.f32.mrb[2].mxu0 }
 0x325   :  { %v373_v37 = vrot.slane %v368_v36, 4  ;;  %v974_v38 = vpop.f32.mrb[3].mxu0 }
 0x327   :  { %v375_v39 = vadd.f32 %v373_v37, %v129_v27 }
 0x329   :  { %1077 = vtanh.f32 %v375_v39 }
 0x333   :  { %v1078_v40 = vpop.eup %1077 }
 0x334   :  { %v378_v41 = vrot.slane %v1078_v40, 4 }
 0x336   :  { %982 = vmatmul.mubr.msk.f32.vlgmr.msra.gmra.mrb[4].mxu1 %vm140_vm8, %v378_v41 }
 0x337   :  { %1056 = vmatpush3.bf16.msra.mxu1 %v1179_v12  ;;  %999 = vmatprep.mubr.msk.f32.mxu1 %vm1117_vm4, %v1116_v13 }
 0x338   :  { %997 = vmatprep.subr.mxu1 %v1116_v13 }
 0x33b   :  { %998 = vmatpush3.msk.msra.mxu1 %vm144_vm3, %v1186_v14 }
 0x33c   :  { %1060 = vmatprep.subr.bf16.mxu1 %v1115_v11 }
 0x409   :  { %v447_v42 = vpop.f32.mrb[4].mxu1 }
 0x40a   :  { %v452_v43 = vrot.slane %v447_v42, 2  ;;  %v983_v44 = vpop.f32.mrb[5].mxu1 }
 0x40c   :  { %v454_v45 = vadd.f32 %v452_v43, %v129_v27 }
 0x40e   :  { %1079 = vtanh.f32 %v454_v45 }
 0x418   :  { %v1080_v46 = vpop.eup %1079 }
 0x419   :  { %v457_v47 = vrot.slane %v1080_v46, 6 }
 0x41b   :  { %991 = vmatmul.mubr.msk.f32.vlgmr.msra.gmra.mrb[4].mxu0 %vm140_vm8, %v457_v47 }
 0x41c   :  { %1059 = vmatpush3.bf16.msra.mxu0 %v1179_v12  ;;  %1008 = vmatprep.mubr.msk.f32.mxu0 %vm1117_vm4, %v1116_v13 }
 0x41d   :  { %1006 = vmatprep.subr.mxu0 %v1116_v13 }
 0x420   :  { %1007 = vmatpush3.msk.msra.mxu0 %vm144_vm3, %v1186_v14 }
 0x421   :  { %1063 = vmatprep.subr.bf16.mxu0 %v1115_v11 }
 0x4ee   :  { %v526_v48 = vpop.f32.mrb[4].mxu0 }
 0x4ef   :  { %v530_v49 = vadd.f32 %v526_v48, %v1214_v25  ;;  %v992_v50 = vpop.f32.mrb[5].mxu0 }
 0x4f1   :  { %1081 = vtanh.f32 %v530_v49 }
 0x4fb   :  { %v1082_v51 = vpop.eup %1081 }
 0x4fc   :  { %1000 = vmatmul.mubr.msk.f32.vlgmr.msra.gmra.mrb[6].mxu1 %vm140_vm8, %v1082_v51 }
 0x4fd   :  { %1062 = vmatpush3.bf16.msra.mxu1 %v1179_v12  ;;  %1017 = vmatprep.mubr.msk.f32.mxu1 %vm1117_vm4, %v1116_v13 }
 0x4fe   :  { %1015 = vmatprep.subr.mxu1 %v1116_v13 }
 0x501   :  { %1016 = vmatpush3.msk.msra.mxu1 %vm144_vm3, %v1186_v14 }
 0x5cf   :  { %v601_v52 = vpop.f32.mrb[6].mxu1 }
 0x5d0   :  { %v606_v53 = vrot.slane %v601_v52, 6  ;;  %v1001_v54 = vpop.f32.mrb[7].mxu1 }
 0x5d2   :  { %v608_v55 = vadd.f32 %v606_v53, %v1214_v25 }
 0x5d4   :  { %1083 = vtanh.f32 %v608_v55 }
 0x5de   :  { %v1084_v56 = vpop.eup %1083 }
 0x5df   :  { %v611_v57 = vrot.slane %v1084_v56, 2 }
 0x5e1   :  { %1009 = vmatmul.mubr.msk.f32.vlgmr.msra.gmra.mrb[6].mxu0 %vm140_vm8, %v611_v57 }
 0x5e2   :  { %1026 = vmatprep.mubr.msk.f32.mxu0 %vm1117_vm4, %v1116_v13  ;;  %1065 = vmatpush3.bf16.msra.mxu0 %v1064_v2 }
 0x5e3   :  { %1024 = vmatprep.subr.mxu0 %v1116_v13 }
 0x5e6   :  { %1025 = vmatpush3.msk.msra.mxu0 %vm144_vm3, %v770_v3 }
 0x6b4   :  { %v680_v58 = vpop.f32.mrb[6].mxu0 }
 0x6b5   :  { %v685_v59 = vrot.slane %v680_v58, 4  ;;  %v1010_v60 = vpop.f32.mrb[7].mxu0 }
 0x6b7   :  { %v687_v61 = vadd.f32 %v685_v59, %v1214_v25 }
 0x6b9   :  { %1085 = vtanh.f32 %v687_v61 }
 0x6c3   :  { %v1086_v62 = vpop.eup %1085 }
 0x6c4   :  { %v690_v63 = vrot.slane %v1086_v62, 4 }
 0x6c6   :  { %1018 = vmatmul.mubr.msk.f32.vlgmr.msra.gmra.mrb[8].mxu1 %vm140_vm8, %v690_v63 }
 0x799   :  { %v759_v4 = vpop.f32.mrb[8].mxu1 }
 0x79a   :  { %v764_v5 = vrot.slane %v759_v4, 2  ;;  %v1019_v6 = vpop.f32.mrb[9].mxu1 }
 0x79c   :  { %v766_v7 = vadd.f32 %v764_v5, %v1214_v25 }
 0x79e   :  { %1087 = vtanh.f32 %v766_v7 }
 0x7a8   :  { %v1088_v8 = vpop.eup %1087 }
 0x7a9   :  { %v779_v9 = vrot.slane %v1088_v8, 6 }
 0x7ab   :  { %1027 = vmatmul.mubr.msk.f32.vlgmr.msra.gmra.mrb[8].mxu0 %vm140_vm8, %v779_v9 }
 0x87e   :  { %v851_v11 = vpop.f32.mrb[8].mxu0 }
 0x87f   :  { %v852_v12 = vadd.f32 %v892_v10, %v851_v11  ;;  %v1028_v13 = vpop.f32.mrb[9].mxu0 }
 0x881   :  { %856 = vst.msk [vmem:[#allocation2] sm:$0x3] %vm855_vm9, %v852_v12 }
 0x882   :  { %1100 = shalt.err (!%p1097_p4)
}
 0x883   :  { %s1101_s25 = scalar_lea.hbm %s1296_s6, 32 }
 0x884   :  { %p1102_p5 = scmp.ne.s32.totalorder %s1296_s6, %s1101_s25  ;;  %p1105_p6 = scmp.lt.u32.totalorder %s1101_s25, %s1296_s6 }
 0x886   :  { %p1107_p7 = pnand %p1105_p6, %p1102_p5 }
 0x888   :  { %1110 = shalt.err (!%p1107_p7)
}
 0x889   :  { %866 = dma.vmem_to_hbm [thread:$0]  %s864_s22, 32, %s1296_s6, [#allocation3]  }
 0x88a   :  { %1111 = dma.done.wait [#allocation3], 32  }
 0x88b   :  { %1112 = vsyncadd [#allocation3], 4294967264 }
 0x88c   :  { %870 = vsyncpa [#allocation3], 1 }

</bundles_post_ra>
